<compile_context>
chip_gen: v6e
topology: v6e:2x2x1
jax: 0.10.0
libtpu: 0.0.40
codegen_flags: <defaults>
</compile_context>

<pallas_src>
import functools

import jax
import jax.numpy as jnp
from jax.experimental import pallas as pl
from jax.experimental.pallas import tpu as pltpu


def _round_up(v, m):
    return ((v + m - 1) // m) * m


def _vmem_budget_bytes():
    """Generation-aware VMEM budget (leave headroom below physical capacity)."""
    cap = 128 << 20
    try:
        cap = int(pltpu.get_tpu_info().vmem_capacity_bytes)
    except Exception:
        pass  # interpret mode / older jax: assume a 128 MiB part
    if cap <= (64 << 20):                                   # v7x-class: 64 MiB/TC
        return max(min(cap - (18 << 20), 46 << 20), 16 << 20)
    return max(min(cap - (28 << 20), 100 << 20), 16 << 20)  # v5e/v6e: 128 MiB


def _footprint_bytes(tm, tn, tk, x_isz, w_isz, out_isz, use_acc_scratch):
    # Double-buffered x / W / bias input tiles + double-buffered output tiles.
    fp = 2 * (tm * tk * x_isz + tk * tn * w_isz + tn * 4)
    fp += 2 * tm * tn * out_isz
    if use_acc_scratch:
        fp += tm * tn * 4  # resident f32 accumulator
    return fp


def _select_tiles(batch_hint, K, N, x_isz, w_isz, out_isz, use_acc_scratch, budget):
    sub = 16 if x_isz == 2 else 8            # bf16 packs 2 rows per sublane
    bpad = _round_up(max(int(batch_hint), 1), sub)
    npad = _round_up(N, 128)
    kpad = _round_up(K, 128)

    tm = min(512, bpad)
    tn = min(1024 if w_isz == 2 else 512, npad)
    tk = min(2048, kpad)

    # Keep >=2 blocks on a 'parallel' axis when the batch is a single M tile so
    # v7x's two TensorCores both get work.
    if tm >= bpad and npad >= 256:
        tn = min(tn, _round_up(npad // 2, 128))

    # Shrink the reduction dim first (never M / output-N first).
    while _footprint_bytes(tm, tn, tk, x_isz, w_isz, out_isz, use_acc_scratch) > budget:
        if tk > 256:
            tk //= 2
        elif tn > 256:
            tn //= 2
        elif tm > 2 * sub:
            tm = max(sub, _round_up(tm // 2, sub))
        elif tk > 128:
            tk //= 2
        elif tn > 128:
            tn //= 2
        else:
            break
    return tm, tn, tk


def _apply_activation(y, activation):
    if activation == "relu":
        return jnp.maximum(y, 0.0)
    if activation == "lrelu":                 # nn.LeakyReLU(0.2)
        return jnp.where(y >= 0.0, y, 0.2 * y)
    if activation == "tanh":
        return jnp.tanh(y)
    if activation == "selu":                  # nn.SELU constants
        alpha = 1.6732632423543772
        scale = 1.0507009873554805
        return scale * jnp.where(y > 0.0, y, alpha * (jnp.exp(y) - 1.0))
    return y                                  # 'none'


def _linear_kernel_f32out(x_ref, w_ref, b_ref, o_ref, *, activation):
    """f32 output: accumulate directly into the resident output block (no scratch)."""
    k = pl.program_id(2)

    @pl.when(k == 0)
    def _init():
        o_ref[...] = jnp.zeros_like(o_ref)

    o_ref[...] += jnp.dot(x_ref[...], w_ref[...],
                          preferred_element_type=jnp.float32)

    @pl.when(k == pl.num_programs(2) - 1)
    def _finalize():
        o_ref[...] = _apply_activation(o_ref[...] + b_ref[...], activation)


def _linear_kernel_acc(x_ref, w_ref, b_ref, o_ref, acc_ref, *, activation):
    """Narrow (e.g. bf16) output: f32 VMEM accumulator, cast only on the final store."""
    k = pl.program_id(2)

    @pl.when(k == 0)
    def _init():
        acc_ref[...] = jnp.zeros_like(acc_ref)

    acc_ref[...] += jnp.dot(x_ref[...], w_ref[...],
                            preferred_element_type=jnp.float32)

    @pl.when(k == pl.num_programs(2) - 1)
    def _finalize():
        y = _apply_activation(acc_ref[...] + b_ref[...], activation)
        o_ref[...] = y.astype(o_ref.dtype)


def make_linear_block(w, b, *, activation="relu", use_bf16_matmul=False,
                      out_dtype=None, batch_hint=128):
    """Build a fused Linear(+activation) apply(x) with one-time weight relayout.

    w: (N, K) PyTorch nn.Linear weight; b: (N,) bias.
    Returns apply(x) computing activation(x @ w.T + b) for x of shape (B, K).
    """
    assert activation in ("relu", "lrelu", "tanh", "selu", "none"), activation
    # TODO(synk): 'prelu' (learned slope) and the 'bn'/'in'/'ln' norm branches of
    # LinearBlock are not in the default config and are not implemented here.
    N, K = w.shape
    assert b.shape == (N,)

    compute_dtype = jnp.bfloat16 if use_bf16_matmul else w.dtype
    out_dtype = jnp.dtype(out_dtype if out_dtype is not None else w.dtype)
    use_acc_scratch = out_dtype != jnp.dtype(jnp.float32)

    x_isz = jnp.dtype(compute_dtype).itemsize
    w_isz = x_isz
    out_isz = out_dtype.itemsize

    budget = _vmem_budget_bytes()
    tm, tn, tk = _select_tiles(batch_hint, K, N, x_isz, w_isz, out_isz,
                               use_acc_scratch, budget)
    Np = _round_up(N, tn)
    Kp = _round_up(K, tk)

    # ---- one-time weight relayout: cast, transpose to (K, N), pad to tile grid ----
    wt = jnp.asarray(w).astype(compute_dtype).T            # (K, N)
    if (Kp, Np) != (K, N):
        wt = jnp.pad(wt, ((0, Kp - K), (0, Np - N)))
    bp = jnp.asarray(b).astype(jnp.float32).reshape(1, N)
    if Np != N:
        bp = jnp.pad(bp, ((0, 0), (0, Np - N)))

    footprint = _footprint_bytes(tm, tn, tk, x_isz, w_isz, out_isz, use_acc_scratch)
    vmem_limit = int(min(budget, max(footprint + (16 << 20), 32 << 20)))

    if use_acc_scratch:
        kernel = functools.partial(_linear_kernel_acc, activation=activation)
        scratch_shapes = [pltpu.VMEM((tm, tn), jnp.float32)]
    else:
        kernel = functools.partial(_linear_kernel_f32out, activation=activation)
        scratch_shapes = []

    def _impl(x, wt, bp):
        B, Kx = x.shape
        assert Kx == K, "input feature dim mismatch"
        Mp = _round_up(B, tm)
        xc = x.astype(compute_dtype)                         # wrapper-side bf16 cast
        if (Mp, Kp) != (B, K):
            xc = jnp.pad(xc, ((0, Mp - B), (0, Kp - K)))     # zero K-pad is exact
        grid = (Mp // tm, Np // tn, Kp // tk)

        cost = pl.CostEstimate(
            flops=2 * B * K * N,
            transcendentals=(B * N if activation in ("tanh", "selu") else 0),
            bytes_accessed=(Mp * Kp * x_isz + Kp * Np * w_isz + Np * 4
                            + Mp * Np * out_isz),
        )

        out = pl.pallas_call(
            kernel,
            out_shape=jax.ShapeDtypeStruct((Mp, Np), out_dtype),
            grid=grid,
            in_specs=[
                pl.BlockSpec((tm, tk), lambda i, j, k: (i, k)),   # x tile
                pl.BlockSpec((tk, tn), lambda i, j, k: (k, j)),   # W^T tile (K, N)
                pl.BlockSpec((1, tn), lambda i, j, k: (0, j)),    # bias tile (j only)
            ],
            out_specs=pl.BlockSpec((tm, tn), lambda i, j, k: (i, j)),
            scratch_shapes=scratch_shapes,
            compiler_params=pltpu.CompilerParams(
                dimension_semantics=("parallel", "parallel", "arbitrary"),
                vmem_limit_bytes=vmem_limit,
            ),
            cost_estimate=cost,
        )(xc, wt, bp)

        if (Mp, Np) != (B, N):
            out = out[:B, :N]
        return out

    impl_jit = jax.jit(_impl)

    def apply(x):
        return impl_jit(x, wt, bp)

    return apply


def linear_block(x, w, b, *, activation="relu", use_bf16_matmul=False, out_dtype=None):
    """One-shot convenience wrapper.  Prefer make_linear_block() so the weight
    relayout (pad/transpose/cast) is amortized across calls."""
    return make_linear_block(w, b, activation=activation,
                             use_bf16_matmul=use_bf16_matmul,
                             out_dtype=out_dtype, batch_hint=x.shape[0])(x)


def _reference(x, w, b, activation="relu"):
    return _apply_activation(x @ w.T + b, activation)


if __name__ == "__main__":
    # Small deterministic shapes consistent with LinearBlock(input_dim, output_dim).
    batch, input_dim, output_dim = 8, 32, 64

    key = jax.random.PRNGKey(0)
    kx, kw, kb = jax.random.split(key, 3)

    x = jax.random.normal(kx, (batch, input_dim), dtype=jnp.float32)
    # PyTorch nn.Linear init: U(-1/sqrt(in), 1/sqrt(in)) for weight and bias.
    bound = 1.0 / (input_dim ** 0.5)
    w = jax.random.uniform(kw, (output_dim, input_dim), jnp.float32, -bound, bound)
    b = jax.random.uniform(kb, (output_dim,), jnp.float32, -bound, bound)

    # Default config: norm='none', activation='relu' (f32 path, no-scratch kernel).
    fc_relu = make_linear_block(w, b, activation="relu", batch_hint=batch)
    out = jax.block_until_ready(fc_relu(x))
    ref = _reference(x, w, b, "relu")
    assert out.shape == (batch, output_dim)
    assert jnp.allclose(out, ref, atol=1e-5, rtol=1e-5), "relu f32 mismatch"

    # tanh epilogue (EUP transcendental in the finalize phase).
    fc_tanh = make_linear_block(w, b, activation="tanh", batch_hint=batch)
    out_t = jax.block_until_ready(fc_tanh(x))
    assert jnp.allclose(out_t, _reference(x, w, b, "tanh"),
                        atol=1e-5, rtol=1e-5), "tanh f32 mismatch"

    # bf16 MXU operands (wrapper-side cast), f32 accumulation + f32 output.
    fc_bf = make_linear_block(w, b, activation="relu",
                              use_bf16_matmul=True, batch_hint=batch)
    out_bf = jax.block_until_ready(fc_bf(x))
    assert jnp.allclose(out_bf, ref, atol=5e-2, rtol=5e-2), "bf16 matmul mismatch"

    # bf16 output path (exercises the f32-scratch kernel variant).
    fc_bf_out = make_linear_block(w, b, activation="relu", use_bf16_matmul=True,
                                  out_dtype=jnp.bfloat16, batch_hint=batch)
    out_bo = jax.block_until_ready(fc_bf_out(x))
    assert jnp.allclose(out_bo.astype(jnp.float32), ref,
                        atol=5e-2, rtol=5e-2), "bf16 output mismatch"

    print("KERNEL_OK")
</pallas_src>

<mosaic_0001>
module attributes {stable_mosaic.version = 11 : i64} {
  func.func @_linear_kernel_f32out(%arg0: i32, %arg1: i32, %arg2: i32, %arg3: memref<8x128xf32, #tpu.memory_space<vmem>>, %arg4: memref<128x128xf32, #tpu.memory_space<vmem>>, %arg5: memref<1x128xf32, #tpu.memory_space<vmem>>, %arg6: memref<8x128xf32, #tpu.memory_space<vmem>>) attributes {dimension_semantics = [#tpu.dimension_semantics<parallel>, #tpu.dimension_semantics<parallel>, #tpu.dimension_semantics<arbitrary>], iteration_bounds = array<i64: 1, 1, 1>, scalar_prefetch = 0 : i64, scratch_operands = 0 : i64, tpu.core_type = #tpu.core_type<tc>, window_params = [{transform_indices = @transform_0, window_bounds = array<i64: 8, 128>}, {transform_indices = @transform_1, window_bounds = array<i64: 128, 128>}, {transform_indices = @transform_2, window_bounds = array<i64: 1, 128>}, {transform_indices = @transform_3, window_bounds = array<i64: 8, 128>}]} {
    %c0_i32 = arith.constant 0 : i32
    %0 = arith.cmpi eq, %arg2, %c0_i32 : i32
    %1 = arith.extui %0 : i1 to i32
    %c0_i32_0 = arith.constant 0 : i32
    %2 = arith.cmpi ne, %1, %c0_i32_0 : i32
    scf.if %2 {
      %cst_10 = arith.constant 0.000000e+00 : f32
      %12 = vector.broadcast %cst_10 : f32 to vector<8x128xf32>
      %c0_11 = arith.constant 0 : index
      %c0_12 = arith.constant 0 : index
      %13 = vector.load %arg6[%c0_11, %c0_12] : memref<8x128xf32, #tpu.memory_space<vmem>>, vector<8x128xf32>
      tpu.vector_store %arg6[%c0_11, %c0_12], %12 {strides = array<i32>} : memref<8x128xf32, #tpu.memory_space<vmem>>, vector<8x128xf32>,
    } else {
    }
    %c0 = arith.constant 0 : index
    %c0_1 = arith.constant 0 : index
    %3 = vector.load %arg6[%c0, %c0_1] : memref<8x128xf32, #tpu.memory_space<vmem>>, vector<8x128xf32>
    %c0_2 = arith.constant 0 : index
    %c0_3 = arith.constant 0 : index
    %4 = vector.load %arg3[%c0_2, %c0_3] : memref<8x128xf32, #tpu.memory_space<vmem>>, vector<8x128xf32>
    %c0_4 = arith.constant 0 : index
    %c0_5 = arith.constant 0 : index
    %5 = vector.load %arg4[%c0_4, %c0_5] : memref<128x128xf32, #tpu.memory_space<vmem>>, vector<128x128xf32>
    %cst = arith.constant dense<0.000000e+00> : vector<8x128xf32>
    %6 = tpu.matmul %4, %5, %cst {dimension_numbers = #tpu.dot_dimension_numbers<[1], [0], [0], [1], [0, 0, 1, 1], [], []>} : vector<8x128xf32>, vector<128x128xf32>, vector<8x128xf32> -> vector<8x128xf32>
    %7 = arith.addf %3, %6 : vector<8x128xf32>
    %c0_6 = arith.constant 0 : index
    %c0_7 = arith.constant 0 : index
    %8 = vector.load %arg6[%c0_6, %c0_7] : memref<8x128xf32, #tpu.memory_space<vmem>>, vector<8x128xf32>
    tpu.vector_store %arg6[%c0_6, %c0_7], %7 {strides = array<i32>} : memref<8x128xf32, #tpu.memory_space<vmem>>, vector<8x128xf32>,
    %c0_i32_8 = arith.constant 0 : i32
    %9 = arith.cmpi eq, %arg2, %c0_i32_8 : i32
    %10 = arith.extui %9 : i1 to i32
    %c0_i32_9 = arith.constant 0 : i32
    %11 = arith.cmpi ne, %10, %c0_i32_9 : i32
    scf.if %11 {
      %c0_10 = arith.constant 0 : index
      %c0_11 = arith.constant 0 : index
      %12 = vector.load %arg6[%c0_10, %c0_11] : memref<8x128xf32, #tpu.memory_space<vmem>>, vector<8x128xf32>
      %c0_12 = arith.constant 0 : index
      %c0_13 = arith.constant 0 : index
      %13 = vector.load %arg5[%c0_12, %c0_13] : memref<1x128xf32, #tpu.memory_space<vmem>>, vector<1x128xf32>
      %14 = vector.broadcast %13 : vector<1x128xf32> to vector<8x128xf32>
      %15 = arith.addf %12, %14 : vector<8x128xf32>
      %cst_14 = arith.constant 0.000000e+00 : f32
      %16 = vector.broadcast %cst_14 : f32 to vector<8x128xf32>
      %17 = arith.maximumf %15, %16 : vector<8x128xf32>
      %c0_15 = arith.constant 0 : index
      %c0_16 = arith.constant 0 : index
      %18 = vector.load %arg6[%c0_15, %c0_16] : memref<8x128xf32, #tpu.memory_space<vmem>>, vector<8x128xf32>
      tpu.vector_store %arg6[%c0_15, %c0_16], %17 {strides = array<i32>} : memref<8x128xf32, #tpu.memory_space<vmem>>, vector<8x128xf32>,
    } else {
    }
    return
  }
  func.func @transform_0(%arg0: i32, %arg1: i32, %arg2: i32) -> (i32, i32) {
    %c0_i32 = arith.constant 0 : i32
    return %arg0, %arg2 : i32, i32
  }
  func.func @transform_1(%arg0: i32, %arg1: i32, %arg2: i32) -> (i32, i32) {
    %c0_i32 = arith.constant 0 : i32
    return %arg2, %arg1 : i32, i32
  }
  func.func @transform_2(%arg0: i32, %arg1: i32, %arg2: i32) -> (i32, i32) {
    %c0_i32 = arith.constant 0 : i32
    %c0_i32_0 = arith.constant 0 : i32
    return %c0_i32, %arg1 : i32, i32
  }
  func.func @transform_3(%arg0: i32, %arg1: i32, %arg2: i32) -> (i32, i32) {
    %c0_i32 = arith.constant 0 : i32
    return %arg0, %arg1 : i32, i32
  }
}

</mosaic_0001>

<bundles_post_ra>
// kernel: _impl.1
= control target key start
LH: loop header
LB: loop body
LE: loop exit
PB: predicated region body
PF: predicated region fallthrough
CT: control target
= control target key end

     0   :  { %8 = vsyncpa [#allocation3], 0  ;;  %s294_s0 = inlined_call_operand.vmem [shape: f32[8,128], index: 0, kind: input, shape index: {}]   ;;  %s295_s1 = inlined_call_operand.hbm [shape: f32[128,128], index: 1, kind: input, shape index: {}]   ;;  %s296_s2 = inlined_call_operand.vmem [shape: f32[1,128], index: 2, kind: input, shape index: {}]   ;;  %s297_s3 = inlined_call_operand.hbm [shape: f32[8,128], index: 3, kind: output, shape index: {}]  }
   0x1   :  { %9 = vsyncpa [#allocation4], 0  ;;  %s256_s12 = smov [#allocation2]  }
   0x2   :  { %s17_s13 = sshll.u32 %s256_s12, 4  ;;  %s18_s13 = int_to_ptr.vmem [resolvable:$true] %s17_s13 }
   0x3   :  { %s220_s14 = scalar_lea.vmem %s18_s13, 2048  ;;  %p225_p1 = scmp.lt.s32.totalorder %s18_s13, %s18_s13 }
   0x4   :  { %p221_p0 = scmp.ne.s32.totalorder %s18_s13, %s220_s14  ;;  %p226_p2 = scmp.lt.s32.totalorder %s220_s14, %s220_s14 }
   0x6   :  { %p227_p3 = por %p226_p2, %p225_p1 }
   0x8   :  { %p228_p4 = pnand %p227_p3, %p221_p0 }
   0xa   :  { %231 = shalt.err (!%p228_p4)
}
   0xb   :  { %s257_s15 = smov 128   ;;  %s258_s16 = smov 8  }
   0xc   :  { %23 = dma.hbm_to_vmem [thread:$0]  %s295_s1, 2048, %s18_s13, [#allocation3], %s257_s15, %s257_s15, %s258_s16  }
   0xd   :  { %252 = dma.done.wait [#allocation3], 2048  }
   0xe   :  { %253 = vsyncadd [#allocation3], 4294965248  ;;  %v259_v0 = vmov 0.0   ;;  %vm260_vm0 = vmmov 0   ;;  %v51_v1 = vld [vmem:[#allocation2 + $0x78] sm:$0xff]  ;;  %v50_v2 = vld [vmem:[#allocation2 + $0x70] sm:$0xff] }
   0xf   :  { %171 = vmatprep.subr.mxu0 %v259_v0  ;;  %203 = vmatprep.mubr.msk.f32.mxu0 %vm260_vm0, %v259_v0  ;;  %v49_v3 = vld [vmem:[#allocation2 + $0x68] sm:$0xff]  ;;  %v48_v4 = vld [vmem:[#allocation2 + $0x60] sm:$0xff]  ;;  %v47_v5 = vld [vmem:[#allocation2 + $0x58] sm:$0xff]  ;;  %s261_s22 = smov [#allocation5]  }
  0x10   :  { %172 = vmatpush3.msra.mxu0 %v51_v1  ;;  %v46_v6 = vld [vmem:[#allocation2 + $0x50] sm:$0xff]  ;;  %v45_v7 = vld [vmem:[#allocation2 + $0x48] sm:$0xff]  ;;  %v44_v8 = vld [vmem:[#allocation2 + $0x40] sm:$0xff]  ;;  %s144_s23 = sshll.u32 %s261_s22, 4  ;;  %s145_s23 = int_to_ptr.vmem [resolvable:$true] %s144_s23 }
  0x11   :  { %173 = vmatprep.subr.mxu0 %v259_v0  ;;  %v43_v9 = vld [vmem:[#allocation2 + $0x38] sm:$0xff]  ;;  %v42_v10 = vld [vmem:[#allocation2 + $0x30] sm:$0xff]  ;;  %v41_v11 = vld [vmem:[#allocation2 + $0x28] sm:$0xff]  ;;  %s232_s24 = scalar_lea.vmem %s145_s23, 128  ;;  %p237_p6 = scmp.lt.s32.totalorder %s145_s23, %s145_s23 }
  0x12   :  { %174 = vmatpush3.msra.mxu0 %v50_v2  ;;  %v40_v12 = vld [vmem:[#allocation2 + $0x20] sm:$0xff]  ;;  %v39_v13 = vld [vmem:[#allocation2 + $0x18] sm:$0xff]  ;;  %v38_v14 = vld [vmem:[#allocation2 + $0x10] sm:$0xff]  ;;  %p233_p5 = scmp.ne.s32.totalorder %s145_s23, %s232_s24  ;;  %p238_p7 = scmp.lt.s32.totalorder %s232_s24, %s232_s24 }
  0x13   :  { %175 = vmatprep.subr.mxu0 %v259_v0  ;;  %v37_v15 = vld [vmem:[#allocation2 + $0x8] sm:$0xff]  ;;  %v36_v16 = vld [vmem:[#allocation2] sm:$0xff] }
  0x14   :  { %176 = vmatpush3.msra.mxu0 %v49_v3  ;;  %v35_v17 = vld [vmem:[%s294_s0] sm:$0xff]  ;;  %p239_p8 = por %p238_p7, %p237_p6 }
  0x15   :  { %177 = vmatprep.subr.mxu0 %v259_v0  ;;  %v153_v19 = vld [vmem:[%s296_s2] ss:$0 sm:$0xff] }
  0x16   :  { %178 = vmatpush3.msra.mxu0 %v48_v4  ;;  %p240_p9 = pnand %p239_p8, %p233_p5 }
  0x17   :  { %179 = vmatprep.subr.mxu0 %v259_v0 }
  0x18   :  { %180 = vmatpush3.msra.mxu0 %v47_v5 }
  0x19   :  { %181 = vmatprep.subr.mxu0 %v259_v0 }
  0x1a   :  { %182 = vmatpush3.msra.mxu0 %v46_v6 }
  0x1b   :  { %183 = vmatprep.subr.mxu0 %v259_v0 }
  0x1c   :  { %184 = vmatpush3.msra.mxu0 %v45_v7 }
  0x1d   :  { %185 = vmatprep.subr.mxu0 %v259_v0 }
  0x1e   :  { %186 = vmatpush3.msra.mxu0 %v44_v8 }
  0x1f   :  { %187 = vmatprep.subr.mxu0 %v259_v0 }
  0x20   :  { %188 = vmatpush3.msra.mxu0 %v43_v9 }
  0x21   :  { %189 = vmatprep.subr.mxu0 %v259_v0 }
  0x22   :  { %190 = vmatpush3.msra.mxu0 %v42_v10 }
  0x23   :  { %191 = vmatprep.subr.mxu0 %v259_v0 }
  0x24   :  { %192 = vmatpush3.msra.mxu0 %v41_v11 }
  0x25   :  { %193 = vmatprep.subr.mxu0 %v259_v0 }
  0x26   :  { %194 = vmatpush3.msra.mxu0 %v40_v12 }
  0x27   :  { %195 = vmatprep.subr.mxu0 %v259_v0 }
  0x28   :  { %196 = vmatpush3.msra.mxu0 %v39_v13 }
  0x29   :  { %197 = vmatprep.subr.mxu0 %v259_v0 }
  0x2a   :  { %198 = vmatpush3.msra.mxu0 %v38_v14 }
  0x2b   :  { %199 = vmatprep.subr.mxu0 %v259_v0 }
  0x2c   :  { %200 = vmatpush3.msra.mxu0 %v37_v15 }
  0x2d   :  { %201 = vmatprep.subr.mxu0 %v259_v0 }
  0x2e   :  { %202 = vmatpush3.msra.mxu0 %v36_v16 }
  0x2f   :  { %204 = vmatmul.mubr.f32.vlgmr.msra.gmra.mxu0 %v35_v17 }
  0xef   :  { %v118_v18 = vpop.f32.mrf.mxu0 }
  0xf0   :  { %v135_v21 = vadd.f32 %v153_v19, %v118_v18 }
  0xf1   :  { %v205_v20 = vpop.f32.mrf.mxu0 }
  0xf2   :  { %v136_v22 = vmax.f32 %v135_v21, 0.0 }
  0xf4   :  { %137 = vst [vmem:[#allocation5] sm:$0xff] %v136_v22 }
  0xf5   :  { %243 = shalt.err (!%p240_p9)
}
  0xf6   :  { %147 = dma.vmem_to_hbm [thread:$0]  %s145_s23, 128, %s297_s3, [#allocation4]  }
  0xf7   :  { %254 = dma.done.wait [#allocation4], 128  }
  0xf8   :  { %255 = vsyncadd [#allocation4], 4294967168 }
  0xf9   :  { %151 = vsyncpa [#allocation3], 1 }
  0xfa   :  { %152 = vsyncpa [#allocation4], 1 }

</bundles_post_ra>
